<compile_context>
chip_gen: v7x
topology: tpu7x:2x2x1
jax: 0.10.0
libtpu: 0.0.40
codegen_flags: <defaults>
</compile_context>

<pallas_src>
import functools
import itertools

import numpy as np
import jax
import jax.numpy as jnp
from jax.experimental import pallas as pl
from jax.experimental.pallas import tpu as pltpu

try:  # fast host-side Hungarian solver if available
    from scipy.optimize import linear_sum_assignment as _scipy_lsa
except Exception:  # pragma: no cover
    _scipy_lsa = None


_ROW_ALIGN = 16      # bf16-friendly sublane alignment for the row tile
_LANE = 128          # lane width: pad target / class dims to multiples of this
_MAX_TILE_M = 256    # row tile upper bound (kernel is VALU-bound; small tiles
                     # minimize padded-row waste and feed both v7x TCs)
_MIN_TILE_M = 64
_MAX_TILE_T = 512    # target-axis tile upper bound (VMEM guard for v7x 64 MiB)


def _round_up(x, m):
    return ((x + m - 1) // m) * m


def _choose_tile_m(n):
    """Pick a row tile (multiple of 16, <= _MAX_TILE_M) minimizing padding."""
    n_aligned = _round_up(max(n, _ROW_ALIGN), _ROW_ALIGN)
    if n_aligned <= _MAX_TILE_M:
        return n_aligned, n_aligned        # single tile, zero extra padding
    best = None
    for t in range(_MAX_TILE_M, _MIN_TILE_M - 1, -_ROW_ALIGN):
        n_pad = _round_up(n_aligned, t)
        key = (n_pad - n, -t)              # least padding, then largest tile
        if best is None or key < best[0]:
            best = (key, t, n_pad)
    return best[1], best[2]


def _choose_tile_t(t_pad):
    """Target-axis tile: full width when small, 128..512 divisor otherwise."""
    if t_pad <= _MAX_TILE_T:
        return t_pad
    for t in (512, 384, 256, 128):
        if t_pad % t == 0:
            return t
    return 128


# ----------------------------------------------------------------------------
# Pallas kernel: builds one [TM, TT] tile of the matching cost matrix
# ----------------------------------------------------------------------------
def _matcher_cost_kernel(logits_ref, pred_ref, onehot_ref, geom_ref, c_ref, *,
                         w_bbox, w_giou, w_conf, enable_softmax):
    logits = logits_ref[...].astype(jnp.float32)              # [TM, C_pad]
    if enable_softmax:
        m = jnp.max(logits, axis=-1, keepdims=True)
        e = jnp.exp(logits - m)
        # accurate EUP reciprocal for the softmax denominator (parity concern)
        prob = e * pl.reciprocal(jnp.sum(e, axis=-1, keepdims=True),
                                 approx=False)
    else:
        prob = jax.nn.sigmoid(logits)

    # Class-cost gather on the MXU in bf16.  The one-hot already holds
    # (-cost_class) at [tgt_id, t], so this matmul directly emits
    # cost_class * (-out_prob[:, tgt_ids]).  Padded class rows are zero.
    class_term = jnp.dot(prob.astype(jnp.bfloat16), onehot_ref[...],
                         preferred_element_type=jnp.float32)   # [TM, TT]

    pred = pred_ref[...]                                       # [TM, 16] f32
    conf_term = -w_conf * jax.nn.sigmoid(pred[:, 8:9])         # [TM, 1]

    tg = geom_ref[...]                                         # [18, TT] f32
    # rows 0..7  : target cxcywh (subject|object), pre-scaled by w_bbox
    # rows 8..12 : subject xyxy + area  (unscaled)
    # rows 13..17: object  xyxy + area  (unscaled)

    def half_cost(off, base):
        # hoist column / row slices once and reuse
        ocx = pred[:, off + 0:off + 1]
        ocy = pred[:, off + 1:off + 2]
        ow = pred[:, off + 2:off + 3]
        oh = pred[:, off + 3:off + 4]

        # L1 (torch.cdist p=1): w_bbox folded into both sides ([TM,1] scales)
        l1 = (jnp.abs(w_bbox * ocx - tg[off + 0:off + 1, :])
              + jnp.abs(w_bbox * ocy - tg[off + 1:off + 2, :])
              + jnp.abs(w_bbox * ow - tg[off + 2:off + 3, :])
              + jnp.abs(w_bbox * oh - tg[off + 3:off + 4, :]))

        # -generalized_box_iou(cxcywh->xyxy(out), xyxy(tgt))
        hw, hh = 0.5 * ow, 0.5 * oh
        ox1, oy1 = ocx - hw, ocy - hh
        ox2, oy2 = ocx + hw, ocy + hh
        area_o = ow * oh                                        # [TM, 1]

        tx1 = tg[base + 0:base + 1, :]
        ty1 = tg[base + 1:base + 2, :]
        tx2 = tg[base + 2:base + 3, :]
        ty2 = tg[base + 3:base + 4, :]
        area_t = tg[base + 4:base + 5, :]                       # [1, TT]

        ltx = jnp.maximum(ox1, tx1)
        lty = jnp.maximum(oy1, ty1)
        rbx = jnp.minimum(ox2, tx2)
        rby = jnp.minimum(oy2, ty2)
        inter = jnp.maximum(rbx - ltx, 0.0) * jnp.maximum(rby - lty, 0.0)
        union = jnp.maximum(area_o + area_t - inter, 1e-7)      # eps clamp
        iou = inter * pl.reciprocal(union, approx=True)         # EUP slot

        cx1 = jnp.minimum(ox1, tx1)
        cy1 = jnp.minimum(oy1, ty1)
        cx2 = jnp.maximum(ox2, tx2)
        cy2 = jnp.maximum(oy2, ty2)
        area_c = jnp.maximum((cx2 - cx1) * (cy2 - cy1), 1e-7)   # eps clamp
        giou = iou - (area_c - union) * pl.reciprocal(area_c, approx=True)

        return l1 - w_giou * giou

    # NOTE: outputs carry no 'level_id' key, so cost_level == 0 and the
    # w_hoi * zeros_like(cost_conf) term is dropped entirely (dead work).
    c_ref[...] = (half_cost(0, 8) + half_cost(4, 13)
                  + class_term + conf_term)


# ----------------------------------------------------------------------------
# jitted preprocessing + pallas_call (removes eager cast/pad round trips)
# ----------------------------------------------------------------------------
@functools.partial(jax.jit, static_argnames=(
    'n_pad', 'c_pad', 'tile_m', 'tile_t',
    'w_bbox', 'w_giou', 'w_conf', 'enable_softmax'))
def _matching_cost_jit(logits, pred_boxes, box_scores, onehot, geom, *,
                       n_pad, c_pad, tile_m, tile_t,
                       w_bbox, w_giou, w_conf, enable_softmax):
    bs, q, num_classes = logits.shape
    n = bs * q
    t_pad = onehot.shape[1]

    # Softmax path must pad the class axis with a large negative so padded
    # columns don't pollute the denominator; sigmoid path pads with 0.
    pad_val = -1e9 if enable_softmax else 0.0
    logits2 = jnp.pad(jnp.reshape(logits, (n, num_classes)),
                      ((0, n_pad - n), (0, c_pad - num_classes)),
                      constant_values=pad_val).astype(jnp.bfloat16)

    # conf + bbox merged into one lane-friendly [N, 16] operand
    pred = jnp.concatenate(
        [jnp.reshape(pred_boxes, (n, 8)).astype(jnp.float32),
         jnp.reshape(box_scores, (n, 1)).astype(jnp.float32),
         jnp.zeros((n, 7), jnp.float32)], axis=1)
    pred = jnp.pad(pred, ((0, n_pad - n), (0, 0)))

    kernel = functools.partial(
        _matcher_cost_kernel,
        w_bbox=w_bbox, w_giou=w_giou, w_conf=w_conf,
        enable_softmax=enable_softmax)

    return pl.pallas_call(
        kernel,
        out_shape=jax.ShapeDtypeStruct((n_pad, t_pad), jnp.float32),
        grid=(n_pad // tile_m, t_pad // tile_t),
        in_specs=[
            pl.BlockSpec((tile_m, c_pad), lambda i, j: (i, 0)),   # logits bf16
            pl.BlockSpec((tile_m, 16), lambda i, j: (i, 0)),      # bbox|conf
            pl.BlockSpec((c_pad, tile_t), lambda i, j: (0, j)),   # onehot bf16
            pl.BlockSpec((18, tile_t), lambda i, j: (0, j)),      # tgt geometry
        ],
        out_specs=pl.BlockSpec((tile_m, tile_t), lambda i, j: (i, j)),
        compiler_params=pltpu.CompilerParams(
            dimension_semantics=("parallel", "parallel")),
    )(logits2, pred, onehot, geom)


# ----------------------------------------------------------------------------
# Host-side helpers
# ----------------------------------------------------------------------------
def _build_target_operands(tgt_ids, tgt_bbox, c_pad, t_pad, w_class, w_bbox):
    """One-hot [C_pad, T_pad] with -w_class folded, and geometry [18, T_pad]."""
    t = tgt_bbox.shape[0]
    onehot = np.zeros((c_pad, t_pad), dtype=np.float32)
    onehot[tgt_ids, np.arange(t)] = -w_class

    # Padding lanes use unit-size dummy boxes so GIoU denominators stay nonzero.
    padded = np.tile(np.array([0.5, 0.5, 1.0, 1.0] * 2, dtype=np.float32),
                     (t_pad, 1))
    padded[:t] = tgt_bbox

    geom = np.zeros((18, t_pad), dtype=np.float32)
    geom[0:8] = w_bbox * padded.T                 # cxcywh rows for the L1 term
    for off, base in ((0, 8), (4, 13)):           # subject / object halves
        cx, cy = padded[:, off + 0], padded[:, off + 1]
        w, h = padded[:, off + 2], padded[:, off + 3]
        x1, y1 = cx - 0.5 * w, cy - 0.5 * h
        x2, y2 = cx + 0.5 * w, cy + 0.5 * h
        geom[base + 0] = x1
        geom[base + 1] = y1
        geom[base + 2] = x2
        geom[base + 3] = y2
        geom[base + 4] = (x2 - x1) * (y2 - y1)
    return onehot, geom


def _linear_sum_assignment(cost):
    """Hungarian assignment; scipy if present, else pure-Python JV fallback."""
    cost = np.asarray(cost, dtype=np.float64)
    if _scipy_lsa is not None:
        r, c = _scipy_lsa(cost)
        return np.asarray(r, np.int64), np.asarray(c, np.int64)

    # TODO(synk): the Hungarian assignment itself is inherently sequential and
    # has no Pallas equivalent; pure-Python fallback only runs when scipy is
    # unavailable (tiny per-image slices).
    nr, nc = cost.shape
    if nr < nc:
        col_ind, row_ind = _linear_sum_assignment(cost.T)
        order = np.argsort(row_ind)
        return row_ind[order].astype(np.int64), col_ind[order].astype(np.int64)

    a = cost.T                       # (n, m), n = nc <= m = nr
    n, m = a.shape
    u = [0.0] * (n + 1)
    v = [0.0] * (m + 1)
    p = [0] * (m + 1)
    way = [0] * (m + 1)
    for i in range(1, n + 1):
        p[0] = i
        j0 = 0
        minv = [np.inf] * (m + 1)
        used = [False] * (m + 1)
        while True:
            used[j0] = True
            i0 = p[j0]
            delta = np.inf
            j1 = 0
            for j in range(1, m + 1):
                if not used[j]:
                    cur = a[i0 - 1, j - 1] - u[i0] - v[j]
                    if cur < minv[j]:
                        minv[j] = cur
                        way[j] = j0
                    if minv[j] < delta:
                        delta = minv[j]
                        j1 = j
            for j in range(m + 1):
                if used[j]:
                    u[p[j]] += delta
                    v[j] -= delta
                else:
                    minv[j] -= delta
            j0 = j1
            if p[j0] == 0:
                break
        while True:
            j1 = way[j0]
            p[j0] = p[j1]
            j0 = j1
            if j0 == 0:
                break

    rows, cols = [], []
    for j in range(1, m + 1):
        if p[j] != 0:
            rows.append(j - 1)
            cols.append(p[j] - 1)
    rows = np.asarray(rows, dtype=np.int64)
    cols = np.asarray(cols, dtype=np.int64)
    order = np.argsort(rows)
    return rows[order], cols[order]


# ----------------------------------------------------------------------------
# Host-side module (glue + Hungarian assignment)
# ----------------------------------------------------------------------------
class HungarianMatcher:
    def __init__(self, cost_class=1.0, cost_bbox=1.0, cost_giou=1.0,
                 cost_conf=1.0, hoi_type='min', cost_hoi_type=1.0,
                 consider_all=False, enable_softmax=False):
        assert cost_class != 0 or cost_bbox != 0 or cost_giou != 0 or cost_conf != 0
        self.cost_class = float(cost_class)
        self.cost_bbox = float(cost_bbox)
        self.cost_giou = float(cost_giou)
        self.cost_conf = float(cost_conf)
        self.hoi_type = hoi_type
        self.cost_hoi_type = float(cost_hoi_type)
        self.consider_all = consider_all
        self.enable_softmax = enable_softmax
        self.training = False  # eval-mode semantics (use raw hoi_id)

    def __call__(self, outputs, targets):
        logits = outputs['logits_per_hoi']          # [bs, Q, num_classes]
        bs, num_queries, num_classes = logits.shape
        n = bs * num_queries

        # ----- host glue: target ids / paired boxes (identical to reference) ---
        unique_hois, cnt = {}, 0
        tgt_ids, tgt_boxes = [], []
        for t in targets:
            boxes = np.asarray(t['boxes'], dtype=np.float32)
            for hoi in t['hois']:
                hoi_id = hoi['hoi_id']
                if self.training and self.consider_all is False:
                    if hoi_id not in unique_hois:
                        unique_hois[hoi_id] = cnt
                        cnt += 1
                    tgt_ids.append(unique_hois[hoi_id])
                else:
                    tgt_ids.append(hoi_id)
                tgt_boxes.append(np.concatenate(
                    [boxes[hoi['subject_id']], boxes[hoi['object_id']]]))
        tgt_ids = np.asarray(tgt_ids, dtype=np.int32)
        tgt_bbox = np.stack(tgt_boxes, axis=0)                  # [T, 8]
        num_tgt = tgt_bbox.shape[0]

        # ----- lane-dense padding / tiling choices ------------------------------
        c_pad = _round_up(num_classes, _LANE)
        t_pad = _round_up(max(num_tgt, 1), _LANE)
        tile_t = _choose_tile_t(t_pad)
        tile_m, n_pad = _choose_tile_m(n)

        onehot, geom = _build_target_operands(
            tgt_ids, tgt_bbox, c_pad, t_pad, self.cost_class, self.cost_bbox)

        C = _matching_cost_jit(
            jnp.asarray(logits),
            jnp.asarray(outputs['pred_boxes']),
            jnp.asarray(outputs['box_scores']),
            jnp.asarray(onehot, dtype=jnp.bfloat16),
            jnp.asarray(geom, dtype=jnp.float32),
            n_pad=n_pad, c_pad=c_pad, tile_m=tile_m, tile_t=tile_t,
            w_bbox=self.cost_bbox, w_giou=self.cost_giou,
            w_conf=self.cost_conf, enable_softmax=self.enable_softmax)
        C = np.asarray(jax.block_until_ready(C))[:n, :num_tgt]
        C = C.reshape(bs, num_queries, num_tgt)

        sizes = [len(v['hois']) for v in targets]
        indices, start = [], 0
        for i, s in enumerate(sizes):
            indices.append(_linear_sum_assignment(C[i][:, start:start + s]))
            start += s
        return indices, C


# ----------------------------------------------------------------------------
# Reference (NumPy) for correctness check
# ----------------------------------------------------------------------------
def _ref_cost(logits, conf, bbox, tgt_ids, tgt_bbox, w):
    sig = lambda x: 1.0 / (1.0 + np.exp(-x))
    prob = sig(logits)
    cost_class = -prob[:, tgt_ids]
    cost_conf = -sig(conf)

    def cdist1(a, b):
        return np.abs(a[:, None, :] - b[None, :, :]).sum(-1)

    def xyxy(b):
        cx, cy, w_, h_ = b[:, 0], b[:, 1], b[:, 2], b[:, 3]
        return np.stack([cx - 0.5 * w_, cy - 0.5 * h_,
                         cx + 0.5 * w_, cy + 0.5 * h_], axis=-1)

    def giou(a, b):
        area_a = (a[:, 2] - a[:, 0]) * (a[:, 3] - a[:, 1])
        area_b = (b[:, 2] - b[:, 0]) * (b[:, 3] - b[:, 1])
        lt = np.maximum(a[:, None, :2], b[None, :, :2])
        rb = np.minimum(a[:, None, 2:], b[None, :, 2:])
        wh = np.clip(rb - lt, 0, None)
        inter = wh[..., 0] * wh[..., 1]
        union = area_a[:, None] + area_b[None, :] - inter
        iou = inter / union
        ltc = np.minimum(a[:, None, :2], b[None, :, :2])
        rbc = np.maximum(a[:, None, 2:], b[None, :, 2:])
        whc = rbc - ltc
        areac = whc[..., 0] * whc[..., 1]
        return iou - (areac - union) / areac

    cost_pbbox = cdist1(bbox[:, :4], tgt_bbox[:, :4])
    cost_obbox = cdist1(bbox[:, 4:], tgt_bbox[:, 4:])
    cost_pgiou = -giou(xyxy(bbox[:, :4]), xyxy(tgt_bbox[:, :4]))
    cost_ogiou = -giou(xyxy(bbox[:, 4:]), xyxy(tgt_bbox[:, 4:]))
    return (w['bbox'] * (cost_pbbox + cost_obbox)
            + w['giou'] * (cost_pgiou + cost_ogiou)
            + w['class'] * cost_class + w['conf'] * cost_conf)


if __name__ == "__main__":
    bs, num_queries, num_classes = 2, 8, 32
    key = jax.random.PRNGKey(0)
    k1, k2, k3 = jax.random.split(key, 3)

    logits_per_hoi = jax.random.normal(k1, (bs, num_queries, num_classes), jnp.float32)
    pred_boxes = jax.random.uniform(k2, (bs, num_queries, 8), jnp.float32,
                                    minval=0.2, maxval=0.6)
    box_scores = jax.random.normal(k3, (bs, num_queries, 1), jnp.float32)
    outputs = {'logits_per_hoi': logits_per_hoi,
               'pred_boxes': pred_boxes,
               'box_scores': box_scores}

    rng = np.random.default_rng(0)

    def make_target(n_boxes, n_hois):
        cxcy = rng.uniform(0.3, 0.7, size=(n_boxes, 2)).astype(np.float32)
        wh = rng.uniform(0.1, 0.4, size=(n_boxes, 2)).astype(np.float32)
        boxes = np.concatenate([cxcy, wh], axis=1)
        hois = [{'hoi_id': int(rng.integers(0, num_classes)),
                 'subject_id': int(rng.integers(0, n_boxes)),
                 'object_id': int(rng.integers(0, n_boxes))}
                for _ in range(n_hois)]
        return {'boxes': boxes, 'hois': hois}

    targets = [make_target(3, 2), make_target(4, 3)]

    matcher = HungarianMatcher(cost_class=1.0, cost_bbox=2.0, cost_giou=1.5,
                               cost_conf=1.0, cost_hoi_type=1.0)
    indices, C_kernel = matcher(outputs, targets)

    # numerical check against numpy reference (tolerance accounts for the bf16
    # logits stream, bf16 MXU class-cost gather and approximate EUP reciprocals)
    tgt_ids = np.array([h['hoi_id'] for t in targets for h in t['hois']])
    tgt_bbox = np.stack([np.concatenate([t['boxes'][h['subject_id']],
                                         t['boxes'][h['object_id']]])
                         for t in targets for h in t['hois']], axis=0)
    C_ref = _ref_cost(
        np.asarray(logits_per_hoi).reshape(-1, num_classes),
        np.asarray(box_scores).reshape(-1, 1),
        np.asarray(pred_boxes).reshape(-1, 8).astype(np.float32),
        tgt_ids, tgt_bbox,
        {'class': 1.0, 'bbox': 2.0, 'giou': 1.5, 'conf': 1.0})
    np.testing.assert_allclose(C_kernel.reshape(C_ref.shape), C_ref,
                               rtol=2e-2, atol=2e-2)

    # assignment check: the solver must match the brute-force optimum on the
    # same per-image cost slices
    sizes = [len(t['hois']) for t in targets]
    start = 0
    for i, ((ri, ci), s) in enumerate(zip(indices, sizes)):
        assert len(ri) == len(ci) == min(num_queries, s)
        sub = C_kernel[i][:, start:start + s]
        got = float(sub[ri, ci].sum())
        best = min(float(sub[list(p), np.arange(s)].sum())
                   for p in itertools.permutations(range(num_queries), s))
        assert abs(got - best) < 1e-5, (got, best)
        start += s

    print("KERNEL_OK")
</pallas_src>

<mosaic_0001>
module attributes {stable_mosaic.version = 11 : i64} {
  func.func @_matcher_cost_kernel(%arg0: i32, %arg1: i32, %arg2: memref<16x128xbf16, #tpu.memory_space<vmem>>, %arg3: memref<16x16xf32, #tpu.memory_space<vmem>>, %arg4: memref<128x128xbf16, #tpu.memory_space<vmem>>, %arg5: memref<18x128xf32, #tpu.memory_space<vmem>>, %arg6: memref<16x128xf32, #tpu.memory_space<vmem>>) attributes {dimension_semantics = [#tpu.dimension_semantics<parallel>, #tpu.dimension_semantics<parallel>], iteration_bounds = array<i64: 1, 1>, scalar_prefetch = 0 : i64, scratch_operands = 0 : i64, tpu.core_type = #tpu.core_type<tc>, window_params = [{transform_indices = @transform_0, window_bounds = array<i64: 16, 128>}, {transform_indices = @transform_1, window_bounds = array<i64: 16, 16>}, {transform_indices = @transform_2, window_bounds = array<i64: 128, 128>}, {transform_indices = @transform_3, window_bounds = array<i64: 18, 128>}, {transform_indices = @transform_4, window_bounds = array<i64: 16, 128>}]} {
    %c0 = arith.constant 0 : index
    %c0_0 = arith.constant 0 : index
    %0 = vector.load %arg2[%c0, %c0_0] : memref<16x128xbf16, #tpu.memory_space<vmem>>, vector<16x128xbf16>
    %1 = arith.extf %0 : vector<16x128xbf16> to vector<16x128xf32>
    %2 = arith.negf %1 : vector<16x128xf32>
    %3 = math.exp %2 : vector<16x128xf32>
    %cst = arith.constant 1.000000e+00 : f32
    %4 = vector.broadcast %cst : f32 to vector<16x128xf32>
    %5 = arith.addf %4, %3 : vector<16x128xf32>
    %6 = arith.divf %4, %5 : vector<16x128xf32>
    %7 = arith.truncf %6 : vector<16x128xf32> to vector<16x128xbf16>
    %c0_1 = arith.constant 0 : index
    %c0_2 = arith.constant 0 : index
    %8 = vector.load %arg4[%c0_1, %c0_2] : memref<128x128xbf16, #tpu.memory_space<vmem>>, vector<128x128xbf16>
    %cst_3 = arith.constant dense<0.000000e+00> : vector<16x128xf32>
    %9 = tpu.matmul %7, %8, %cst_3 {dimension_numbers = #tpu.dot_dimension_numbers<[1], [0], [0], [1], [0, 0, 1, 1], [], []>} : vector<16x128xbf16>, vector<128x128xbf16>, vector<16x128xf32> -> vector<16x128xf32>
    %c0_4 = arith.constant 0 : index
    %c0_5 = arith.constant 0 : index
    %10 = vector.load %arg3[%c0_4, %c0_5] : memref<16x16xf32, #tpu.memory_space<vmem>>, vector<16x16xf32>
    %11 = vector.extract_strided_slice %10 {offsets = [0, 8], sizes = [16, 1], strides = [1, 1]} : vector<16x16xf32> to vector<16x1xf32>
    %12 = arith.negf %11 : vector<16x1xf32>
    %13 = math.exp %12 : vector<16x1xf32>
    %cst_6 = arith.constant 1.000000e+00 : f32
    %14 = vector.broadcast %cst_6 : f32 to vector<16x1xf32>
    %15 = arith.addf %14, %13 : vector<16x1xf32>
    %16 = arith.divf %14, %15 : vector<16x1xf32>
    %cst_7 = arith.constant -1.000000e+00 : f32
    %17 = vector.broadcast %cst_7 : f32 to vector<16x1xf32>
    %18 = arith.mulf %17, %16 : vector<16x1xf32>
    %c0_8 = arith.constant 0 : index
    %c0_9 = arith.constant 0 : index
    %19 = vector.load %arg5[%c0_8, %c0_9] : memref<18x128xf32, #tpu.memory_space<vmem>>, vector<18x128xf32>
    %20 = vector.extract_strided_slice %10 {offsets = [0, 0], sizes = [16, 1], strides = [1, 1]} : vector<16x16xf32> to vector<16x1xf32>
    %21 = vector.extract_strided_slice %10 {offsets = [0, 1], sizes = [16, 1], strides = [1, 1]} : vector<16x16xf32> to vector<16x1xf32>
    %22 = vector.extract_strided_slice %10 {offsets = [0, 2], sizes = [16, 1], strides = [1, 1]} : vector<16x16xf32> to vector<16x1xf32>
    %23 = vector.extract_strided_slice %10 {offsets = [0, 3], sizes = [16, 1], strides = [1, 1]} : vector<16x16xf32> to vector<16x1xf32>
    %cst_10 = arith.constant 2.000000e+00 : f32
    %24 = vector.broadcast %cst_10 : f32 to vector<16x1xf32>
    %25 = arith.mulf %24, %20 : vector<16x1xf32>
    %26 = vector.extract_strided_slice %19 {offsets = [0, 0], sizes = [1, 128], strides = [1, 1]} : vector<18x128xf32> to vector<1x128xf32>
    %27 = vector.broadcast %25 : vector<16x1xf32> to vector<16x128xf32>
    %28 = vector.broadcast %26 : vector<1x128xf32> to vector<16x128xf32>
    %29 = arith.subf %27, %28 : vector<16x128xf32>
    %30 = math.absf %29 : vector<16x128xf32>
    %cst_11 = arith.constant 2.000000e+00 : f32
    %31 = vector.broadcast %cst_11 : f32 to vector<16x1xf32>
    %32 = arith.mulf %31, %21 : vector<16x1xf32>
    %33 = vector.extract_strided_slice %19 {offsets = [1, 0], sizes = [1, 128], strides = [1, 1]} : vector<18x128xf32> to vector<1x128xf32>
    %34 = vector.broadcast %32 : vector<16x1xf32> to vector<16x128xf32>
    %35 = vector.broadcast %33 : vector<1x128xf32> to vector<16x128xf32>
    %36 = arith.subf %34, %35 : vector<16x128xf32>
    %37 = math.absf %36 : vector<16x128xf32>
    %38 = arith.addf %30, %37 : vector<16x128xf32>
    %cst_12 = arith.constant 2.000000e+00 : f32
    %39 = vector.broadcast %cst_12 : f32 to vector<16x1xf32>
    %40 = arith.mulf %39, %22 : vector<16x1xf32>
    %41 = vector.extract_strided_slice %19 {offsets = [2, 0], sizes = [1, 128], strides = [1, 1]} : vector<18x128xf32> to vector<1x128xf32>
    %42 = vector.broadcast %40 : vector<16x1xf32> to vector<16x128xf32>
    %43 = vector.broadcast %41 : vector<1x128xf32> to vector<16x128xf32>
    %44 = arith.subf %42, %43 : vector<16x128xf32>
    %45 = math.absf %44 : vector<16x128xf32>
    %46 = arith.addf %38, %45 : vector<16x128xf32>
    %cst_13 = arith.constant 2.000000e+00 : f32
    %47 = vector.broadcast %cst_13 : f32 to vector<16x1xf32>
    %48 = arith.mulf %47, %23 : vector<16x1xf32>
    %49 = vector.extract_strided_slice %19 {offsets = [3, 0], sizes = [1, 128], strides = [1, 1]} : vector<18x128xf32> to vector<1x128xf32>
    %50 = vector.broadcast %48 : vector<16x1xf32> to vector<16x128xf32>
    %51 = vector.broadcast %49 : vector<1x128xf32> to vector<16x128xf32>
    %52 = arith.subf %50, %51 : vector<16x128xf32>
    %53 = math.absf %52 : vector<16x128xf32>
    %54 = arith.addf %46, %53 : vector<16x128xf32>
    %cst_14 = arith.constant 5.000000e-01 : f32
    %55 = vector.broadcast %cst_14 : f32 to vector<16x1xf32>
    %56 = arith.mulf %55, %22 : vector<16x1xf32>
    %cst_15 = arith.constant 5.000000e-01 : f32
    %57 = vector.broadcast %cst_15 : f32 to vector<16x1xf32>
    %58 = arith.mulf %57, %23 : vector<16x1xf32>
    %59 = arith.subf %20, %56 : vector<16x1xf32>
    %60 = arith.subf %21, %58 : vector<16x1xf32>
    %61 = arith.addf %20, %56 : vector<16x1xf32>
    %62 = arith.addf %21, %58 : vector<16x1xf32>
    %63 = arith.mulf %22, %23 : vector<16x1xf32>
    %64 = vector.extract_strided_slice %19 {offsets = [8, 0], sizes = [1, 128], strides = [1, 1]} : vector<18x128xf32> to vector<1x128xf32>
    %65 = vector.extract_strided_slice %19 {offsets = [9, 0], sizes = [1, 128], strides = [1, 1]} : vector<18x128xf32> to vector<1x128xf32>
    %66 = vector.extract_strided_slice %19 {offsets = [10, 0], sizes = [1, 128], strides = [1, 1]} : vector<18x128xf32> to vector<1x128xf32>
    %67 = vector.extract_strided_slice %19 {offsets = [11, 0], sizes = [1, 128], strides = [1, 1]} : vector<18x128xf32> to vector<1x128xf32>
    %68 = vector.extract_strided_slice %19 {offsets = [12, 0], sizes = [1, 128], strides = [1, 1]} : vector<18x128xf32> to vector<1x128xf32>
    %69 = vector.broadcast %59 : vector<16x1xf32> to vector<16x128xf32>
    %70 = vector.broadcast %64 : vector<1x128xf32> to vector<16x128xf32>
    %71 = arith.maximumf %69, %70 : vector<16x128xf32>
    %72 = vector.broadcast %60 : vector<16x1xf32> to vector<16x128xf32>
    %73 = vector.broadcast %65 : vector<1x128xf32> to vector<16x128xf32>
    %74 = arith.maximumf %72, %73 : vector<16x128xf32>
    %75 = vector.broadcast %61 : vector<16x1xf32> to vector<16x128xf32>
    %76 = vector.broadcast %66 : vector<1x128xf32> to vector<16x128xf32>
    %77 = arith.minimumf %75, %76 : vector<16x128xf32>
    %78 = vector.broadcast %62 : vector<16x1xf32> to vector<16x128xf32>
    %79 = vector.broadcast %67 : vector<1x128xf32> to vector<16x128xf32>
    %80 = arith.minimumf %78, %79 : vector<16x128xf32>
    %81 = arith.subf %77, %71 : vector<16x128xf32>
    %cst_16 = arith.constant 0.000000e+00 : f32
    %82 = vector.broadcast %cst_16 : f32 to vector<16x128xf32>
    %83 = arith.maximumf %81, %82 : vector<16x128xf32>
    %84 = arith.subf %80, %74 : vector<16x128xf32>
    %cst_17 = arith.constant 0.000000e+00 : f32
    %85 = vector.broadcast %cst_17 : f32 to vector<16x128xf32>
    %86 = arith.maximumf %84, %85 : vector<16x128xf32>
    %87 = arith.mulf %83, %86 : vector<16x128xf32>
    %88 = vector.broadcast %63 : vector<16x1xf32> to vector<16x128xf32>
    %89 = vector.broadcast %68 : vector<1x128xf32> to vector<16x128xf32>
    %90 = arith.addf %88, %89 : vector<16x128xf32>
    %91 = arith.subf %90, %87 : vector<16x128xf32>
    %cst_18 = arith.constant 1.000000e-07 : f32
    %92 = vector.broadcast %cst_18 : f32 to vector<16x128xf32>
    %93 = arith.maximumf %91, %92 : vector<16x128xf32>
    %94 = tpu.reciprocal %93 {approx = true} : vector<16x128xf32> -> vector<16x128xf32>
    %95 = arith.mulf %87, %94 : vector<16x128xf32>
    %96 = vector.broadcast %59 : vector<16x1xf32> to vector<16x128xf32>
    %97 = vector.broadcast %64 : vector<1x128xf32> to vector<16x128xf32>
    %98 = arith.minimumf %96, %97 : vector<16x128xf32>
    %99 = vector.broadcast %60 : vector<16x1xf32> to vector<16x128xf32>
    %100 = vector.broadcast %65 : vector<1x128xf32> to vector<16x128xf32>
    %101 = arith.minimumf %99, %100 : vector<16x128xf32>
    %102 = vector.broadcast %61 : vector<16x1xf32> to vector<16x128xf32>
    %103 = vector.broadcast %66 : vector<1x128xf32> to vector<16x128xf32>
    %104 = arith.maximumf %102, %103 : vector<16x128xf32>
    %105 = vector.broadcast %62 : vector<16x1xf32> to vector<16x128xf32>
    %106 = vector.broadcast %67 : vector<1x128xf32> to vector<16x128xf32>
    %107 = arith.maximumf %105, %106 : vector<16x128xf32>
    %108 = arith.subf %104, %98 : vector<16x128xf32>
    %109 = arith.subf %107, %101 : vector<16x128xf32>
    %110 = arith.mulf %108, %109 : vector<16x128xf32>
    %cst_19 = arith.constant 1.000000e-07 : f32
    %111 = vector.broadcast %cst_19 : f32 to vector<16x128xf32>
    %112 = arith.maximumf %110, %111 : vector<16x128xf32>
    %113 = arith.subf %112, %93 : vector<16x128xf32>
    %114 = tpu.reciprocal %112 {approx = true} : vector<16x128xf32> -> vector<16x128xf32>
    %115 = arith.mulf %113, %114 : vector<16x128xf32>
    %116 = arith.subf %95, %115 : vector<16x128xf32>
    %cst_20 = arith.constant 1.500000e+00 : f32
    %117 = vector.broadcast %cst_20 : f32 to vector<16x128xf32>
    %118 = arith.mulf %117, %116 : vector<16x128xf32>
    %119 = arith.subf %54, %118 : vector<16x128xf32>
    %120 = vector.extract_strided_slice %10 {offsets = [0, 4], sizes = [16, 1], strides = [1, 1]} : vector<16x16xf32> to vector<16x1xf32>
    %121 = vector.extract_strided_slice %10 {offsets = [0, 5], sizes = [16, 1], strides = [1, 1]} : vector<16x16xf32> to vector<16x1xf32>
    %122 = vector.extract_strided_slice %10 {offsets = [0, 6], sizes = [16, 1], strides = [1, 1]} : vector<16x16xf32> to vector<16x1xf32>
    %123 = vector.extract_strided_slice %10 {offsets = [0, 7], sizes = [16, 1], strides = [1, 1]} : vector<16x16xf32> to vector<16x1xf32>
    %cst_21 = arith.constant 2.000000e+00 : f32
    %124 = vector.broadcast %cst_21 : f32 to vector<16x1xf32>
    %125 = arith.mulf %124, %120 : vector<16x1xf32>
    %126 = vector.extract_strided_slice %19 {offsets = [4, 0], sizes = [1, 128], strides = [1, 1]} : vector<18x128xf32> to vector<1x128xf32>
    %127 = vector.broadcast %125 : vector<16x1xf32> to vector<16x128xf32>
    %128 = vector.broadcast %126 : vector<1x128xf32> to vector<16x128xf32>
    %129 = arith.subf %127, %128 : vector<16x128xf32>
    %130 = math.absf %129 : vector<16x128xf32>
    %cst_22 = arith.constant 2.000000e+00 : f32
    %131 = vector.broadcast %cst_22 : f32 to vector<16x1xf32>
    %132 = arith.mulf %131, %121 : vector<16x1xf32>
    %133 = vector.extract_strided_slice %19 {offsets = [5, 0], sizes = [1, 128], strides = [1, 1]} : vector<18x128xf32> to vector<1x128xf32>
    %134 = vector.broadcast %132 : vector<16x1xf32> to vector<16x128xf32>
    %135 = vector.broadcast %133 : vector<1x128xf32> to vector<16x128xf32>
    %136 = arith.subf %134, %135 : vector<16x128xf32>
    %137 = math.absf %136 : vector<16x128xf32>
    %138 = arith.addf %130, %137 : vector<16x128xf32>
    %cst_23 = arith.constant 2.000000e+00 : f32
    %139 = vector.broadcast %cst_23 : f32 to vector<16x1xf32>
    %140 = arith.mulf %139, %122 : vector<16x1xf32>
    %141 = vector.extract_strided_slice %19 {offsets = [6, 0], sizes = [1, 128], strides = [1, 1]} : vector<18x128xf32> to vector<1x128xf32>
    %142 = vector.broadcast %140 : vector<16x1xf32> to vector<16x128xf32>
    %143 = vector.broadcast %141 : vector<1x128xf32> to vector<16x128xf32>
    %144 = arith.subf %142, %143 : vector<16x128xf32>
    %145 = math.absf %144 : vector<16x128xf32>
    %146 = arith.addf %138, %145 : vector<16x128xf32>
    %cst_24 = arith.constant 2.000000e+00 : f32
    %147 = vector.broadcast %cst_24 : f32 to vector<16x1xf32>
    %148 = arith.mulf %147, %123 : vector<16x1xf32>
    %149 = vector.extract_strided_slice %19 {offsets = [7, 0], sizes = [1, 128], strides = [1, 1]} : vector<18x128xf32> to vector<1x128xf32>
    %150 = vector.broadcast %148 : vector<16x1xf32> to vector<16x128xf32>
    %151 = vector.broadcast %149 : vector<1x128xf32> to vector<16x128xf32>
    %152 = arith.subf %150, %151 : vector<16x128xf32>
    %153 = math.absf %152 : vector<16x128xf32>
    %154 = arith.addf %146, %153 : vector<16x128xf32>
    %cst_25 = arith.constant 5.000000e-01 : f32
    %155 = vector.broadcast %cst_25 : f32 to vector<16x1xf32>
    %156 = arith.mulf %155, %122 : vector<16x1xf32>
    %cst_26 = arith.constant 5.000000e-01 : f32
    %157 = vector.broadcast %cst_26 : f32 to vector<16x1xf32>
    %158 = arith.mulf %157, %123 : vector<16x1xf32>
    %159 = arith.subf %120, %156 : vector<16x1xf32>
    %160 = arith.subf %121, %158 : vector<16x1xf32>
    %161 = arith.addf %120, %156 : vector<16x1xf32>
    %162 = arith.addf %121, %158 : vector<16x1xf32>
    %163 = arith.mulf %122, %123 : vector<16x1xf32>
    %164 = vector.extract_strided_slice %19 {offsets = [13, 0], sizes = [1, 128], strides = [1, 1]} : vector<18x128xf32> to vector<1x128xf32>
    %165 = vector.extract_strided_slice %19 {offsets = [14, 0], sizes = [1, 128], strides = [1, 1]} : vector<18x128xf32> to vector<1x128xf32>
    %166 = vector.extract_strided_slice %19 {offsets = [15, 0], sizes = [1, 128], strides = [1, 1]} : vector<18x128xf32> to vector<1x128xf32>
    %167 = vector.extract_strided_slice %19 {offsets = [16, 0], sizes = [1, 128], strides = [1, 1]} : vector<18x128xf32> to vector<1x128xf32>
    %168 = vector.extract_strided_slice %19 {offsets = [17, 0], sizes = [1, 128], strides = [1, 1]} : vector<18x128xf32> to vector<1x128xf32>
    %169 = vector.broadcast %159 : vector<16x1xf32> to vector<16x128xf32>
    %170 = vector.broadcast %164 : vector<1x128xf32> to vector<16x128xf32>
    %171 = arith.maximumf %169, %170 : vector<16x128xf32>
    %172 = vector.broadcast %160 : vector<16x1xf32> to vector<16x128xf32>
    %173 = vector.broadcast %165 : vector<1x128xf32> to vector<16x128xf32>
    %174 = arith.maximumf %172, %173 : vector<16x128xf32>
    %175 = vector.broadcast %161 : vector<16x1xf32> to vector<16x128xf32>
    %176 = vector.broadcast %166 : vector<1x128xf32> to vector<16x128xf32>
    %177 = arith.minimumf %175, %176 : vector<16x128xf32>
    %178 = vector.broadcast %162 : vector<16x1xf32> to vector<16x128xf32>
    %179 = vector.broadcast %167 : vector<1x128xf32> to vector<16x128xf32>
    %180 = arith.minimumf %178, %179 : vector<16x128xf32>
    %181 = arith.subf %177, %171 : vector<16x128xf32>
    %cst_27 = arith.constant 0.000000e+00 : f32
    %182 = vector.broadcast %cst_27 : f32 to vector<16x128xf32>
    %183 = arith.maximumf %181, %182 : vector<16x128xf32>
    %184 = arith.subf %180, %174 : vector<16x128xf32>
    %cst_28 = arith.constant 0.000000e+00 : f32
    %185 = vector.broadcast %cst_28 : f32 to vector<16x128xf32>
    %186 = arith.maximumf %184, %185 : vector<16x128xf32>
    %187 = arith.mulf %183, %186 : vector<16x128xf32>
    %188 = vector.broadcast %163 : vector<16x1xf32> to vector<16x128xf32>
    %189 = vector.broadcast %168 : vector<1x128xf32> to vector<16x128xf32>
    %190 = arith.addf %188, %189 : vector<16x128xf32>
    %191 = arith.subf %190, %187 : vector<16x128xf32>
    %cst_29 = arith.constant 1.000000e-07 : f32
    %192 = vector.broadcast %cst_29 : f32 to vector<16x128xf32>
    %193 = arith.maximumf %191, %192 : vector<16x128xf32>
    %194 = tpu.reciprocal %193 {approx = true} : vector<16x128xf32> -> vector<16x128xf32>
    %195 = arith.mulf %187, %194 : vector<16x128xf32>
    %196 = vector.broadcast %159 : vector<16x1xf32> to vector<16x128xf32>
    %197 = vector.broadcast %164 : vector<1x128xf32> to vector<16x128xf32>
    %198 = arith.minimumf %196, %197 : vector<16x128xf32>
    %199 = vector.broadcast %160 : vector<16x1xf32> to vector<16x128xf32>
    %200 = vector.broadcast %165 : vector<1x128xf32> to vector<16x128xf32>
    %201 = arith.minimumf %199, %200 : vector<16x128xf32>
    %202 = vector.broadcast %161 : vector<16x1xf32> to vector<16x128xf32>
    %203 = vector.broadcast %166 : vector<1x128xf32> to vector<16x128xf32>
    %204 = arith.maximumf %202, %203 : vector<16x128xf32>
    %205 = vector.broadcast %162 : vector<16x1xf32> to vector<16x128xf32>
    %206 = vector.broadcast %167 : vector<1x128xf32> to vector<16x128xf32>
    %207 = arith.maximumf %205, %206 : vector<16x128xf32>
    %208 = arith.subf %204, %198 : vector<16x128xf32>
    %209 = arith.subf %207, %201 : vector<16x128xf32>
    %210 = arith.mulf %208, %209 : vector<16x128xf32>
    %cst_30 = arith.constant 1.000000e-07 : f32
    %211 = vector.broadcast %cst_30 : f32 to vector<16x128xf32>
    %212 = arith.maximumf %210, %211 : vector<16x128xf32>
    %213 = arith.subf %212, %193 : vector<16x128xf32>
    %214 = tpu.reciprocal %212 {approx = true} : vector<16x128xf32> -> vector<16x128xf32>
    %215 = arith.mulf %213, %214 : vector<16x128xf32>
    %216 = arith.subf %195, %215 : vector<16x128xf32>
    %cst_31 = arith.constant 1.500000e+00 : f32
    %217 = vector.broadcast %cst_31 : f32 to vector<16x128xf32>
    %218 = arith.mulf %217, %216 : vector<16x128xf32>
    %219 = arith.subf %154, %218 : vector<16x128xf32>
    %220 = arith.addf %119, %219 : vector<16x128xf32>
    %221 = arith.addf %220, %9 : vector<16x128xf32>
    %222 = vector.broadcast %18 : vector<16x1xf32> to vector<16x128xf32>
    %223 = arith.addf %221, %222 : vector<16x128xf32>
    %c0_32 = arith.constant 0 : index
    %c0_33 = arith.constant 0 : index
    %224 = vector.load %arg6[%c0_32, %c0_33] : memref<16x128xf32, #tpu.memory_space<vmem>>, vector<16x128xf32>
    tpu.vector_store %arg6[%c0_32, %c0_33], %223 {strides = array<i32>} : memref<16x128xf32, #tpu.memory_space<vmem>>, vector<16x128xf32>,
    return
  }
  func.func @transform_0(%arg0: i32, %arg1: i32) -> (i32, i32) {
    %c0_i32 = arith.constant 0 : i32
    %c0_i32_0 = arith.constant 0 : i32
    return %arg0, %c0_i32 : i32, i32
  }
  func.func @transform_1(%arg0: i32, %arg1: i32) -> (i32, i32) {
    %c0_i32 = arith.constant 0 : i32
    %c0_i32_0 = arith.constant 0 : i32
    return %arg0, %c0_i32 : i32, i32
  }
  func.func @transform_2(%arg0: i32, %arg1: i32) -> (i32, i32) {
    %c0_i32 = arith.constant 0 : i32
    %c0_i32_0 = arith.constant 0 : i32
    return %c0_i32, %arg1 : i32, i32
  }
  func.func @transform_3(%arg0: i32, %arg1: i32) -> (i32, i32) {
    %c0_i32 = arith.constant 0 : i32
    %c0_i32_0 = arith.constant 0 : i32
    return %c0_i32, %arg1 : i32, i32
  }
  func.func @transform_4(%arg0: i32, %arg1: i32) -> (i32, i32) {
    %c0_i32 = arith.constant 0 : i32
    return %arg0, %arg1 : i32, i32
  }
}

</mosaic_0001>

<bundles_post_ra>
// kernel: _matching_cost_jit.1
= control target key start
LH: loop header
LB: loop body
LE: loop exit
PB: predicated region body
PF: predicated region fallthrough
CT: control target
= control target key end

     0   :  { %s757_s17 = smov 127   ;;  %v758_v3 = vmov 0   ;;  %s759_s22 = smov 126   ;;  %v760_v6 = vmov 0.0   ;;  %vm761_vm0 = vmmov 0   ;;  %s1090_s0 = inlined_call_operand.vmem [shape: bf16[16,128], index: 0, kind: input, shape index: {}]   ;;  %s1091_s1 = inlined_call_operand.vmem [shape: f32[16,16], index: 1, kind: input, shape index: {}]   ;;  %s1092_s2 = inlined_call_operand.vmem [shape: bf16[128,128], index: 2, kind: input, shape index: {}]   ;;  %s1093_s3 = inlined_call_operand.vmem [shape: f32[18,128], index: 3, kind: input, shape index: {}]   ;;  %s1094_s4 = inlined_call_operand.hbm [shape: f32[16,128], index: 4, kind: output, shape index: {}]  }
   0x1   :  { %v801_v0 = vld [vmem:[%s1091_s1] sm:$0xff]  ;;  %v807_v1 = vld [vmem:[%s1091_s1 + $0x8] sm:$0xff]  ;;  %661 = vset.pattern.permute.xlu0 %v758_v3  ;;  %662 = vset.pattern.permute.xlu1 %v758_v3  ;;  %v695_v9 = vld [vmem:[%s1092_s2 + $0x10] sm:$0xff]  }
   0x2   :  { %250 = vrot.lane.b32.xlu1 %v801_v0, %s757_s17  ;;  %v234_v2 = vmul.f32 0.5, %v801_v0  ;;  %v235_v4 = vmul.f32 0.5, %v807_v1  ;;  %v693_v5 = vld [vmem:[%s1092_s2] sm:$0xff]   ;;  %625 = vmatprep.subr.bf16.mxu0 %v760_v6  ;;  %v694_v7 = vld [vmem:[%s1092_s2 + $0x8] sm:$0xff]   ;;  %v820_v8 = vmul.f32 2.0, %v807_v1  ;;  %v827_v10 = vmul.f32 2.0, %v801_v0 }
   0x3   :  { %626 = vmatpush3.bf16.msra.mxu0 %v693_v5  ;;  %641 = vmatprep.mubr.msk.bf16.mxu0 %vm761_vm0, %v760_v6  ;;  %v613_v11 = vld [vmem:[%s1090_s0] sm:$0xff]  }
   0x4   :  { %238 = vrot.lane.b32.xlu0 %v234_v2, %s759_s22  ;;  %627 = vmatprep.subr.bf16.mxu0 %v760_v6  ;;  %v614_v12 = vunpack.c.l.bf16 %v613_v11  ;;  %v615_v13 = vunpack.c.h.bf16 %v613_v11 }
   0x6   :  { %252 = vrot.lane.b32.xlu1 %v807_v1, %s757_s17 }
   0x7   :  { %628 = vmatpush3.bf16.msra.mxu0 %v694_v7 }
   0x8   :  { %240 = vrot.lane.b32.xlu0 %v235_v4, %s759_s22  ;;  %629 = vmatprep.subr.bf16.mxu0 %v760_v6 }
   0xa   :  { %169 = vperm.xlu1 %662, %v820_v8  }
   0xb   :  { %9 = vsyncpa [#allocation3], 0  ;;  %630 = vmatpush3.bf16.msra.mxu0 %v695_v9  ;;  %v696_v14 = vld [vmem:[%s1092_s2 + $0x18] sm:$0xff]   ;;  %v600_v15 = vmul.f32 -1.442695, %v614_v12  ;;  %v762_v17 = vmov 1   ;;  %v172_v40 = vlaneseq }
   0xc   :  { %164 = vperm.xlu0 %661, %v827_v10   ;;  %v601_v16 = vmul.f32 -1.442695, %v615_v13  ;;  %631 = vmatprep.subr.bf16.mxu0 %v760_v6  ;;  %v697_v18 = vld [vmem:[%s1092_s2 + $0x20] sm:$0xff]   ;;  %v763_v19 = vmov 2   ;;  %v764_v20 = vmov 3   ;;  %v698_v21 = vld [vmem:[%s1092_s2 + $0x28] sm:$0xff]  }
   0xd   :  { %701 = vpow2.f32 %v600_v15  ;;  %v699_v23 = vld [vmem:[%s1092_s2 + $0x30] sm:$0xff]   ;;  %v700_v27 = vld [vmem:[%s1092_s2 + $0x38] sm:$0xff]   ;;  %v765_v37 = vmov 6   ;;  %v874_v42 = vshrl.u32 %v172_v40, 7  ;;  %v611_v43 = vmul.f32 -1.442695, %v807_v1 }
   0xe   :  { %663 = vset.pattern.permute.xlu1 %v762_v17  ;;  %703 = vpow2.f32 %v601_v16  ;;  %v885_v45 = vld [vmem:[%s1093_s3] sm:$0xff]  ;;  %v766_v52 = vmov 4  }
   0xf   :  { %181 = vperm.xlu1 %663, %v827_v10   ;;  %632 = vmatpush3.bf16.msra.mxu0 %v696_v14  ;;  %v880_v44 = vsub.s32 0, %v874_v42  ;;  %v889_v47 = vsub.s32 1, %v874_v42  ;;  %v208_v55 = vsub.s32 2, %v874_v42  ;;  %v226_v40 = vsub.s32 3, %v874_v42 }
  0x10   :  { %664 = vset.pattern.permute.xlu0 %v762_v17  ;;  %633 = vmatprep.subr.bf16.mxu0 %v760_v6 }
  0x11   :  { %185 = vperm.xlu0 %664, %v820_v8   ;;  %v175_v48 = vrot.slane %v885_v45, %v880_v44  ;;  %v191_v53 = vrot.slane %v885_v45, %v889_v47  ;;  %v209_v62 = vrot.slane %v885_v45, %v208_v55 }
  0x13   :  { %665 = vset.pattern.permute.xlu1 %v763_v19  ;;  %634 = vmatpush3.bf16.msra.mxu0 %v697_v18  ;;  %v768_v18 = vmov 7  }
  0x14   :  { %199 = vperm.xlu1 %665, %v827_v10   ;;  %635 = vmatprep.subr.bf16.mxu0 %v760_v6 }
  0x15   :  { %666 = vset.pattern.permute.xlu0 %v764_v20 }
  0x16   :  { %217 = vperm.xlu0 %666, %v827_v10  }
  0x17   :  { %v702_v22 = vpop.eup %701  ;;  %636 = vmatpush3.bf16.msra.mxu0 %v698_v21  ;;  %v769_v21 = vmov 8  }
  0x18   :  { %203 = vperm.xlu1 %665, %v820_v8   ;;  %v704_v24 = vpop.eup %703  ;;  %637 = vmatprep.subr.bf16.mxu0 %v760_v6  ;;  %v29_v25 = vadd.f32 1.0, %v702_v22 }
  0x19   :  { %v30_v26 = vadd.f32 1.0, %v704_v24 }
  0x1a   :  { %669 = vset.pattern.permute.xlu0 %v763_v19  ;;  %705 = vrcp.f32 %v29_v25 }
  0x1b   :  { %638 = vmatpush3.bf16.msra.mxu0 %v699_v23  ;;  %707 = vrcp.f32 %v30_v26 }
  0x1c   :  { %667 = vset.pattern.permute.xlu1 %v764_v20  ;;  %639 = vmatprep.subr.bf16.mxu0 %v760_v6  ;;  %709 = vpow2.f32 %v611_v43  ;;  %v767_v6 = vmov 5   ;;  %v610_v20 = vmul.f32 -1.442695, %v801_v0 }
  0x1d   :  { %221 = vperm.xlu1 %667, %v820_v8  }
  0x1f   :  { %640 = vmatpush3.bf16.msra.mxu0 %v700_v27 }
  0x21   :  { %668 = vset.pattern.permute.xlu1 %v763_v19 }
  0x24   :  { %v706_v28 = vpop.eup %705 }
  0x25   :  { %v708_v29 = vpop.eup %707 }
  0x26   :  { %v35_v30 = vpack.c.bf16 %v708_v29, %v706_v28  ;;  %v710_v63 = vpop.eup %709 }
  0x27   :  { %v150_v7 = vadd.f32 1.0, %v710_v63 }
  0x28   :  { %642 = vmatmul.mubr.bf16.vlgmr.msra.gmra.mrb[0].mxu0 %v35_v30 }
  0x29   :  { %711 = vrcp.f32 %v150_v7 }
  0x2a   :  { %713 = vpow2.f32 %v610_v20 }
  0x74   :  { %v251_v31 = vpop.permute.xlu1 %250 }
  0x75   :  { %v256_v32 = vmul.f32 %v251_v31, %v801_v0 }
  0x76   :  { %v239_v33 = vpop.permute.xlu0 %238 }
  0x77   :  { %330 = vperm.xlu1 %668, %v256_v32   ;;  %v867_v39 = vsub.f32 %v801_v0, %v239_v33  ;;  %v246_v41 = vadd.f32 %v239_v33, %v801_v0 }
  0x78   :  { %v253_v34 = vpop.permute.xlu1 %252 }
  0x79   :  { %v859_v35 = vmul.f32 %v253_v34, %v807_v1 }
  0x7a   :  { %v241_v36 = vpop.permute.xlu0 %240 }
  0x7b   :  { %670 = vset.pattern.permute.xlu1 %v765_v37  ;;  %335 = vperm.xlu0 %669, %v859_v35   ;;  %v864_v38 = vsub.f32 %v807_v1, %v241_v36  ;;  %v247_v51 = vadd.f32 %v241_v36, %v807_v1 }
  0x7c   :  { %517 = vperm.xlu1 %670, %v256_v32  }
  0x7f   :  { %672 = vset.pattern.permute.xlu0 %v758_v3 }
  0x80   :  { %671 = vset.pattern.permute.xlu1 %v758_v3  ;;  %265 = vperm.xlu0 %672, %v864_v38  }
  0x81   :  { %260 = vperm.xlu1 %671, %v867_v39  }
  0x84   :  { %290 = vperm.xlu0 %672, %v246_v41  }
  0x85   :  { %673 = vset.pattern.permute.xlu1 %v762_v17 }
  0x86   :  { %275 = vperm.xlu1 %673, %v867_v39  }
  0x88   :  { %675 = vset.pattern.permute.xlu0 %v762_v17 }
  0x89   :  { %305 = vperm.xlu0 %675, %v246_v41   ;;  %v170_v46 = vpop.permute.xlu1 %169 }
  0x8a   :  { %279 = vperm.xlu1 %673, %v864_v38   ;;  %v177_v57 = vsub.f32 %v170_v46, %v175_v48 }
  0x8b   :  { %v165_v49 = vpop.permute.xlu0 %164 }
  0x8c   :  { %v176_v50 = vsub.f32 %v165_v49, %v175_v48  ;;  %v179_v2 = vand.u32 2147483647, %v177_v57 }
  0x8d   :  { %678 = vset.pattern.permute.xlu0 %v766_v52 }
  0x8e   :  { %674 = vset.pattern.permute.xlu1 %v758_v3  ;;  %455 = vperm.xlu0 %678, %v864_v38   ;;  %v182_v54 = vpop.permute.xlu1 %181  ;;  %v178_v58 = vand.u32 2147483647, %v176_v50  ;;  %v406_v50 = vsub.s32 5, %v874_v42 }
  0x8f   :  { %295 = vperm.xlu1 %674, %v247_v51   ;;  %v192_v56 = vsub.f32 %v182_v54, %v191_v53 }
  0x90   :  { %v186_v59 = vpop.permute.xlu0 %185 }
  0x91   :  { %v194_v60 = vand.u32 2147483647, %v192_v56  ;;  %v193_v61 = vsub.f32 %v186_v59, %v191_v53  ;;  %v424_v56 = vsub.s32 6, %v874_v42  ;;  %v159_v59 = vld [vmem:[%s1093_s3 + $0x10] sm:$0x3] }
  0x92   :  { %479 = vperm.xlu0 %678, %v246_v41  }
  0x93   :  { %676 = vset.pattern.permute.xlu1 %v762_v17  ;;  %v200_v1 = vpop.permute.xlu1 %199  ;;  %v196_v4 = vadd.f32 %v194_v60, %v178_v58  ;;  %v195_v5 = vand.u32 2147483647, %v193_v61  ;;  %v712_v17 = vpop.eup %711 }
  0x94   :  { %309 = vperm.xlu1 %676, %v247_v51   ;;  %v210_v3 = vsub.f32 %v200_v1, %v209_v62  ;;  %v156_v19 = vmul.f32 -1.0, %v712_v17  ;;  %v714_v22 = vpop.eup %713 }
  0x95   :  { %v197_v13 = vadd.f32 %v195_v5, %v179_v2  ;;  %v149_v23 = vadd.f32 1.0, %v714_v22  ;;  %v925_v26 = vpop.permute.xlu0 %217 }
  0x96   :  { %681 = vset.pattern.permute.xlu0 %v767_v6  ;;  %v212_v9 = vand.u32 2147483647, %v210_v3  ;;  %v340_v3 = vsub.s32 4, %v874_v42 }
  0x97   :  { %493 = vperm.xlu0 %681, %v246_v41   ;;  %v204_v11 = vpop.permute.xlu1 %203  ;;  %715 = vrcp.f32 %v149_v23  ;;  %v158_v41 = vld [vmem:[%s1093_s3 + $0x8] sm:$0xff]  ;;  %s770_s3 = smov [#allocation2]  }
  0x98   :  { %677 = vset.pattern.permute.xlu1 %v766_v52  ;;  %v211_v12 = vsub.f32 %v204_v11, %v209_v62  ;;  %v904_v14 = vadd.f32 %v212_v9, %v196_v4  ;;  %v951_v43 = vrot.slane %v158_v41, %v226_v40  ;;  %v957_v48 = vrot.slane %v158_v41, %v208_v55  ;;  %s589_s16 = sshll.u32 %s770_s3, 4  ;;  %s590_s16 = int_to_ptr.vmem [resolvable:$true] %s589_s16 }
  0x99   :  { %451 = vperm.xlu1 %677, %v867_v39   ;;  %v960_v49 = vrot.slane %v158_v41, %v889_v47  ;;  %v967_v53 = vrot.slane %v158_v41, %v880_v44  ;;  %v978_v60 = vrot.slane %v158_v41, %v406_v50  ;;  %v985_v62 = vrot.slane %v159_v59, %v880_v44  ;;  %s733_s17 = scalar_lea.vmem %s590_s16, 256  ;;  %p738_p1 = scmp.lt.s32.totalorder %s590_s16, %s590_s16 }
  0x9a   :  { %v213_v15 = vand.u32 2147483647, %v211_v12  ;;  %v990_v2 = vrot.slane %v158_v41, %v424_v56  ;;  %v341_v17 = vrot.slane %v158_v41, %v340_v3  ;;  %p734_p0 = scmp.ne.s32.totalorder %s590_s16, %s733_s17  ;;  %p739_p2 = scmp.lt.s32.totalorder %s733_s17, %s733_s17 }
  0x9b   :  { %684 = vset.pattern.permute.xlu0 %v766_v52 }
  0x9c   :  { %381 = vperm.xlu0 %684, %v827_v10   ;;  %v908_v16 = vadd.f32 %v213_v15, %v197_v13  ;;  %v923_v25 = vpop.permute.xlu1 %221  ;;  %p740_p3 = por %p739_p2, %p738_p1 }
  0x9d   :  { %679 = vset.pattern.permute.xlu1 %v767_v6 }
  0x9e   :  { %465 = vperm.xlu1 %679, %v867_v39   ;;  %p741_p4 = pnand %p740_p3, %p734_p0 }
  0xa0   :  { %687 = vset.pattern.permute.xlu0 %v767_v6 }
  0xa1   :  { %401 = vperm.xlu0 %687, %v820_v8   ;;  %v716_v0 = vpop.eup %715 }
  0xa2   :  { %469 = vperm.xlu1 %679, %v864_v38   ;;  %v155_v24 = vmul.f32 -1.0, %v716_v0 }
  0xa5   :  { %689 = vset.pattern.permute.xlu0 %v768_v18 }
  0xa6   :  { %680 = vset.pattern.permute.xlu1 %v766_v52  ;;  %433 = vperm.xlu0 %689, %v827_v10  }
  0xa7   :  { %483 = vperm.xlu1 %680, %v247_v51  }
  0xaa   :  { %692 = vset.pattern.permute.xlu0 %v769_v21 }
  0xab   :  { %682 = vset.pattern.permute.xlu1 %v767_v6  ;;  %577 = vperm.xlu0 %692, %v156_v19  }
  0xac   :  { %497 = vperm.xlu1 %682, %v247_v51   ;;  %v442_v51 = vsub.s32 7, %v874_v42 }
  0xae   :  { %v982_v61 = vrot.slane %v158_v41, %v442_v51 }
  0xb0   :  { %683 = vset.pattern.permute.xlu1 %v765_v37 }
  0xb1   :  { %521 = vperm.xlu1 %683, %v859_v35  }
  0xb5   :  { %685 = vset.pattern.permute.xlu1 %v766_v52 }
  0xb6   :  { %385 = vperm.xlu1 %685, %v820_v8  }
  0xba   :  { %686 = vset.pattern.permute.xlu1 %v767_v6 }
  0xbb   :  { %397 = vperm.xlu1 %686, %v827_v10  }
  0xbf   :  { %688 = vset.pattern.permute.xlu1 %v765_v37 }
  0xc0   :  { %415 = vperm.xlu1 %688, %v827_v10  }
  0xc4   :  { %419 = vperm.xlu1 %688, %v820_v8  }
  0xc8   :  { %690 = vset.pattern.permute.xlu1 %v768_v18 }
  0xc9   :  { %437 = vperm.xlu1 %690, %v820_v8  }
  0xcd   :  { %691 = vset.pattern.permute.xlu1 %v769_v21 }
  0xce   :  { %572 = vperm.xlu1 %691, %v155_v24  }
  0xf6   :  { %v927_v27 = vpop.permute.xlu1 %330 }
  0xfa   :  { %v929_v28 = vpop.permute.xlu0 %335 }
  0xfb   :  { %v931_v29 = vpop.permute.xlu1 %517  ;;  %v933_v10 = vpop.f32.mrb[0].mxu0 }
  0xfc   :  { %v643_v30 = vpop.f32.mrb[1].mxu0 }
  0xfd   :  { %v937_v32 = vpop.f32.mrb[2].mxu0 }
  0xfe   :  { %v644_v33 = vpop.f32.mrb[3].mxu0 }
  0xff   :  { %v935_v31 = vpop.permute.xlu0 %265 }
 0x100   :  { %v261_v8 = vpop.permute.xlu1 %260  ;;  %v273_v24 = vmax.f32 %v935_v31, %v967_v53 }
 0x101   :  { %v272_v63 = vmax.f32 %v261_v8, %v967_v53  ;;  %v352_v30 = vmin.f32 %v261_v8, %v967_v53 }
 0x103   :  { %v291_v34 = vpop.permute.xlu0 %290 }
 0x104   :  { %v302_v57 = vmin.f32 %v291_v34, %v957_v48  ;;  %v356_v18 = vmax.f32 %v291_v34, %v957_v48 }
 0x105   :  { %v276_v35 = vpop.permute.xlu1 %275 }
 0x106   :  { %v286_v55 = vmax.f32 %v276_v35, %v960_v49  ;;  %v318_v6 = vsub.f32 %v302_v57, %v272_v63  ;;  %v354_v19 = vmin.f32 %v276_v35, %v960_v49  ;;  %v342_v63 = vadd.f32 %v341_v17, %v927_v27 }
 0x108   :  { %v306_v36 = vpop.permute.xlu0 %305  ;;  %v320_v21 = vmax.f32 %v318_v6, 0.0 }
 0x109   :  { %v939_v37 = vpop.permute.xlu1 %279  ;;  %v316_v54 = vmin.f32 %v306_v36, %v951_v43  ;;  %v358_v7 = vmax.f32 %v306_v36, %v951_v43 }
 0x10a   :  { %v287_v22 = vmax.f32 %v939_v37, %v960_v49 }
 0x10b   :  { %v322_v1 = vsub.f32 %v316_v54, %v286_v55  ;;  %v362_v34 = vsub.f32 %v358_v7, %v354_v19  ;;  %v527_v54 = vrot.slane %v159_v59, %v889_v47  ;;  %v355_v19 = vmin.f32 %v939_v37, %v960_v49 }
 0x10d   :  { %v943_v39 = vpop.permute.xlu0 %455  ;;  %v324_v11 = vmax.f32 %v322_v1, 0.0  ;;  %v360_v1 = vsub.f32 %v356_v18, %v352_v30  ;;  %v528_v47 = vadd.f32 %v527_v54, %v931_v29 }
 0x10e   :  { %v941_v38 = vpop.permute.xlu1 %295  ;;  %v539_v30 = vmin.f32 %v943_v39, %v978_v60 }
 0x10f   :  { %v303_v23 = vmin.f32 %v941_v38, %v957_v48  ;;  %v1012_v36 = vmul.f32 %v324_v11, %v320_v21  ;;  %v1022_v7 = vmul.f32 %v362_v34, %v360_v1  ;;  %v357_v29 = vmax.f32 %v941_v38, %v957_v48 }
 0x111   :  { %v964_v52 = vpop.permute.xlu0 %479  ;;  %v344_v11 = vsub.f32 %v342_v63, %v1012_v36 }
 0x112   :  { %v490_v9 = vmin.f32 %v964_v52, %v982_v61  ;;  %v542_v59 = vmax.f32 %v964_v52, %v982_v61 }
 0x113   :  { %v953_v46 = vpop.permute.xlu1 %309  ;;  %v346_v21 = vmax.f32 %v344_v11, 1e-07 }
 0x114   :  { %v317_v12 = vmin.f32 %v953_v46, %v951_v43  ;;  %v359_v27 = vmax.f32 %v953_v46, %v951_v43  ;;  %v366_v43 = vmax.f32 %v1022_v7, 1e-07 }
 0x115   :  { %717 = vrcp.f32 %v346_v21 }
 0x116   :  { %v494_v4 = vpop.permute.xlu0 %493  ;;  %v323_v41 = vsub.f32 %v317_v12, %v287_v22  ;;  %719 = vrcp.f32 %v366_v43 }
 0x117   :  { %v504_v13 = vmin.f32 %v494_v4, %v985_v62  ;;  %v544_v6 = vmax.f32 %v494_v4, %v985_v62  ;;  %v343_v4 = vadd.f32 %v341_v17, %v929_v28  ;;  %v463_v28 = vmax.f32 %v943_v39, %v978_v60 }
 0x118   :  { %v452_v58 = vpop.permute.xlu1 %451  ;;  %v325_v12 = vmax.f32 %v323_v41, 0.0 }
 0x119   :  { %v462_v5 = vmax.f32 %v452_v58, %v978_v60 }
 0x11b   :  { %v506_v20 = vsub.f32 %v490_v9, %v462_v5  ;;  %v319_v5 = vsub.f32 %v303_v23, %v273_v24  ;;  %v538_v9 = vmin.f32 %v452_v58, %v978_v60  ;;  %v353_v58 = vmin.f32 %v935_v31, %v967_v53  ;;  %v382_v1 = vpop.permute.xlu0 %381 }
 0x11c   :  { %v363_v31 = vsub.f32 %v359_v27, %v355_v19  ;;  %v407_v27 = vrot.slane %v885_v45, %v406_v50  ;;  %v425_v50 = vrot.slane %v885_v45, %v424_v56 }
 0x11d   :  { %v466_v44 = vpop.permute.xlu1 %465  ;;  %v508_v57 = vmax.f32 %v506_v20, 0.0  ;;  %v546_v20 = vsub.f32 %v542_v59, %v538_v9 }
 0x11e   :  { %v476_v15 = vmax.f32 %v466_v44, %v990_v2  ;;  %v540_v55 = vmin.f32 %v466_v44, %v990_v2 }
 0x120   :  { %v510_v0 = vsub.f32 %v504_v13, %v476_v15  ;;  %v548_v44 = vsub.f32 %v544_v6, %v540_v55  ;;  %v321_v15 = vmax.f32 %v319_v5, 0.0 }
 0x121   :  { %v470_v33 = vpop.permute.xlu1 %469 }
 0x122   :  { %v512_v35 = vmax.f32 %v510_v0, 0.0  ;;  %v1041_v46 = vmul.f32 %v325_v12, %v321_v15  ;;  %v550_v53 = vmul.f32 %v548_v44, %v546_v20  ;;  %v477_v17 = vmax.f32 %v470_v33, %v990_v2 }
 0x123   :  { %v541_v37 = vmin.f32 %v470_v33, %v990_v2  ;;  %v361_v0 = vsub.f32 %v357_v29, %v353_v58  ;;  %v443_v58 = vrot.slane %v885_v45, %v442_v51 }
 0x124   :  { %v1019_v8 = vmul.f32 %v512_v35, %v508_v57  ;;  %v345_v34 = vsub.f32 %v343_v4, %v1041_v46  ;;  %v552_v2 = vmax.f32 %v550_v53, 1e-07 }
 0x125   :  { %v1051_v57 = vmul.f32 %v363_v31, %v361_v0 }
 0x126   :  { %v484_v13 = vpop.permute.xlu1 %483  ;;  %v530_v52 = vsub.f32 %v528_v47, %v1019_v8  ;;  %v347_v5 = vmax.f32 %v345_v34, 1e-07  ;;  %v402_v47 = vpop.permute.xlu0 %401 }
 0x127   :  { %v491_v18 = vmin.f32 %v484_v13, %v982_v61  ;;  %v543_v38 = vmax.f32 %v484_v13, %v982_v61  ;;  %v367_v39 = vmax.f32 %v1051_v57, 1e-07  ;;  %v391_v13 = vrot.slane %v885_v45, %v340_v3 }
 0x128   :  { %v532_v24 = vmax.f32 %v530_v52, 1e-07  ;;  %v227_v3 = vrot.slane %v885_v45, %v226_v40 }
 0x129   :  { %v507_v22 = vsub.f32 %v491_v18, %v463_v28  ;;  %v547_v61 = vsub.f32 %v543_v38, %v539_v30  ;;  %v392_v59 = vsub.f32 %v382_v1, %v391_v13  ;;  %v368_v18 = vsub.f32 %v366_v43, %v346_v21 }
 0x12a   :  { %721 = vrcp.f32 %v532_v24  ;;  %v434_v29 = vpop.permute.xlu0 %433  ;;  %v228_v28 = vsub.f32 %v925_v26, %v227_v3  ;;  %v409_v43 = vsub.f32 %v402_v47, %v407_v27  ;;  %v229_v34 = vsub.f32 %v923_v25, %v227_v3 }
 0x12b   :  { %v498_v49 = vpop.permute.xlu1 %497  ;;  %v509_v33 = vmax.f32 %v507_v22, 0.0  ;;  %723 = vrcp.f32 %v552_v2  ;;  %v394_v31 = vand.u32 2147483647, %v392_v59 }
 0x12c   :  { %v505_v48 = vmin.f32 %v498_v49, %v985_v62  ;;  %v545_v23 = vmax.f32 %v498_v49, %v985_v62  ;;  %725 = vrcp.f32 %v347_v5  ;;  %v444_v49 = vsub.f32 %v434_v29, %v443_v58 }
 0x12d   :  { %727 = vrcp.f32 %v367_v39  ;;  %v230_v42 = vand.u32 2147483647, %v228_v28  ;;  %v411_v57 = vand.u32 2147483647, %v409_v43 }
 0x12e   :  { %v511_v41 = vsub.f32 %v505_v48, %v477_v17  ;;  %v549_v35 = vsub.f32 %v545_v23, %v541_v37  ;;  %v554_v17 = vsub.f32 %v552_v2, %v532_v24  ;;  %v446_v26 = vand.u32 2147483647, %v444_v49  ;;  %v578_v28 = vpop.permute.xlu0 %577 }
 0x12f   :  { %v369_v24 = vsub.f32 %v367_v39, %v347_v5  ;;  %v231_v39 = vand.u32 2147483647, %v229_v34 }
 0x130   :  { %v513_v55 = vmax.f32 %v511_v41, 0.0  ;;  %v522_v63 = vpop.permute.xlu1 %521  ;;  %v551_v6 = vmul.f32 %v549_v35, %v547_v61 }
 0x131   :  { %v529_v62 = vadd.f32 %v527_v54, %v522_v63  ;;  %v718_v54 = vpop.eup %717 }
 0x132   :  { %v515_v9 = vmul.f32 %v513_v55, %v509_v33  ;;  %v553_v7 = vmax.f32 %v551_v6, 1e-07  ;;  %v720_v44 = vpop.eup %719  ;;  %v350_v20 = vmul.f32 %v718_v54, %v1012_v36  ;;  %v232_v6 = vadd.f32 %v230_v42, %v904_v14 }
 0x133   :  { %v372_v53 = vmul.f32 %v720_v44, %v368_v18  ;;  %v233_v14 = vadd.f32 %v231_v39, %v908_v16 }
 0x134   :  { %v531_v60 = vsub.f32 %v529_v62, %v515_v9  ;;  %v722_v15 = vpop.eup %721 }
 0x135   :  { %v386_v11 = vpop.permute.xlu1 %385  ;;  %v724_v52 = vpop.eup %723  ;;  %v536_v51 = vmul.f32 %v722_v15, %v1019_v8  ;;  %v374_v38 = vsub.f32 %v350_v20, %v372_v53 }
 0x136   :  { %v533_v12 = vmax.f32 %v531_v60, 1e-07  ;;  %v726_v21 = vpop.eup %725  ;;  %v558_v36 = vmul.f32 %v724_v52, %v554_v17  ;;  %v393_v23 = vsub.f32 %v386_v11, %v391_v13 }
 0x137   :  { %v728_v48 = vpop.eup %727  ;;  %v351_v8 = vmul.f32 %v726_v21, %v1041_v46  ;;  %v376_v61 = vmul.f32 1.5, %v374_v38 }
 0x138   :  { %729 = vrcp.f32 %v533_v12  ;;  %v560_v30 = vsub.f32 %v536_v51, %v558_v36  ;;  %v555_v63 = vsub.f32 %v553_v7, %v533_v12  ;;  %v395_v62 = vand.u32 2147483647, %v393_v23 }
 0x139   :  { %731 = vrcp.f32 %v553_v7  ;;  %v373_v1 = vmul.f32 %v728_v48, %v369_v24  ;;  %v378_v46 = vsub.f32 %v232_v6, %v376_v61 }
 0x13a   :  { %v398_v4 = vpop.permute.xlu1 %397  ;;  %v562_v11 = vmul.f32 1.5, %v560_v30  ;;  %v413_v59 = vadd.f32 %v411_v57, %v395_v62 }
 0x13b   :  { %v408_v19 = vsub.f32 %v398_v4, %v407_v27  ;;  %v375_v25 = vsub.f32 %v351_v8, %v373_v1 }
 0x13d   :  { %v410_v37 = vand.u32 2147483647, %v408_v19  ;;  %v377_v7 = vmul.f32 1.5, %v375_v25 }
 0x13f   :  { %v416_v40 = vpop.permute.xlu1 %415  ;;  %v412_v56 = vadd.f32 %v410_v37, %v394_v31  ;;  %v379_v20 = vsub.f32 %v233_v14, %v377_v7 }
 0x140   :  { %v426_v22 = vsub.f32 %v416_v40, %v425_v50 }
 0x142   :  { %v730_v45 = vpop.eup %729  ;;  %v428_v0 = vand.u32 2147483647, %v426_v22 }
 0x143   :  { %v420_v41 = vpop.permute.xlu1 %419  ;;  %v732_v35 = vpop.eup %731  ;;  %v537_v55 = vmul.f32 %v730_v45, %v515_v9 }
 0x144   :  { %v430_v2 = vadd.f32 %v428_v0, %v412_v56  ;;  %v427_v33 = vsub.f32 %v420_v41, %v425_v50  ;;  %v559_v13 = vmul.f32 %v732_v35, %v555_v63 }
 0x146   :  { %v448_v60 = vadd.f32 %v446_v26, %v430_v2  ;;  %v429_v47 = vand.u32 2147483647, %v427_v33  ;;  %v561_v44 = vsub.f32 %v537_v55, %v559_v13 }
 0x148   :  { %v438_v54 = vpop.permute.xlu1 %437  ;;  %v564_v5 = vsub.f32 %v448_v60, %v562_v11  ;;  %v431_v15 = vadd.f32 %v429_v47, %v413_v59  ;;  %v563_v19 = vmul.f32 1.5, %v561_v44 }
 0x149   :  { %v445_v27 = vsub.f32 %v438_v54, %v443_v58 }
 0x14a   :  { %v566_v4 = vadd.f32 %v564_v5, %v378_v46 }
 0x14b   :  { %v447_v9 = vand.u32 2147483647, %v445_v27 }
 0x14c   :  { %v568_v12 = vadd.f32 %v566_v4, %v933_v10 }
 0x14d   :  { %v449_v3 = vadd.f32 %v447_v9, %v431_v15  ;;  %v573_v18 = vpop.permute.xlu1 %572 }
 0x14e   :  { %v580_v29 = vadd.f32 %v573_v18, %v568_v12 }
 0x14f   :  { %v565_v50 = vsub.f32 %v449_v3, %v563_v19 }
 0x150   :  { %582 = vst [vmem:[#allocation2] sm:$0xff] %v580_v29 }
 0x151   :  { %v567_v52 = vadd.f32 %v565_v50, %v379_v20 }
 0x153   :  { %v569_v58 = vadd.f32 %v567_v52, %v937_v32 }
 0x155   :  { %v581_v31 = vadd.f32 %v578_v28, %v569_v58 }
 0x157   :  { %583 = vst [vmem:[#allocation2 + $0x8] sm:$0xff] %v581_v31 }
 0x158   :  { %744 = shalt.err (!%p741_p4)
}
 0x159   :  { %s745_s20 = scalar_lea.hbm %s1094_s4, 256 }
 0x15a   :  { %p746_p5 = scmp.ne.s32.totalorder %s1094_s4, %s745_s20  ;;  %p749_p6 = scmp.lt.u32.totalorder %s745_s20, %s1094_s4 }
 0x15c   :  { %p751_p7 = pnand %p749_p6, %p746_p5 }
 0x15e   :  { %754 = shalt.err (!%p751_p7)
}
 0x15f   :  { %s771_s24 = smov 128   ;;  %s772_s25 = smov 8  }
 0x160   :  { %595 = dma.vmem_to_hbm [thread:$0]  %s590_s16, 256, %s1094_s4, [#allocation3], %s771_s24, %s771_s24, %s772_s25  }
 0x161   :  { %755 = dma.done.wait [#allocation3], 256  }
 0x162   :  { %756 = vsyncadd [#allocation3], 4294967040 }
 0x163   :  { %599 = vsyncpa [#allocation3], 1 }

</bundles_post_ra>
